<compile_context>
chip_gen: v6e
topology: v6e:2x2x1
jax: 0.10.0
libtpu: 0.0.40
codegen_flags: <defaults>
</compile_context>

<pallas_src>
import functools

import jax
import jax.numpy as jnp
import numpy as np
from jax import lax
from jax.experimental import pallas as pl
from jax.experimental.pallas import tpu as pltpu


# ----------------------------------------------------------------------------
# Kernel
# ----------------------------------------------------------------------------
def _self_attention_kernel(x_ref, wqkv_ref, wproj_ref, bproj_ref, o_ref, *,
                           heads):
    """One grid step: a (Bt, N, C) slab of tokens, weights resident in VMEM.

    x_ref     : (Bt, N, C)       activations
    wqkv_ref  : (C, 3C)          bf16, softmax scale folded into the q columns
    wproj_ref : (heads, hd, C)   bf16, Wproj^T split into per-head row blocks
    bproj_ref : (1, C)           f32
    o_ref     : (Bt, N, C)       output
    """
    Bt, N, C = x_ref.shape
    hd = C // heads

    # ---- QKV projection: one big MXU matmul over all Bt*N tokens -----------
    x2d = x_ref[...].reshape(Bt * N, C).astype(jnp.bfloat16)
    qkv = jnp.dot(x2d, wqkv_ref[...], preferred_element_type=jnp.float32)
    qkv = qkv.reshape(Bt, N, 3 * C)                              # f32

    # ---- per-head attention + fused per-head output projection -------------
    y = None                                                     # (Bt*N, C) f32
    for h in range(heads):
        q = qkv[:, :, h * hd:(h + 1) * hd].astype(jnp.bfloat16)              # (Bt,N,hd)
        k = qkv[:, :, C + h * hd:C + (h + 1) * hd].astype(jnp.bfloat16)      # (Bt,N,hd)
        v = qkv[:, :, 2 * C + h * hd:2 * C + (h + 1) * hd].astype(jnp.bfloat16)

        # scores: contract hd directly (batched over Bt); no explicit k.T.
        s = lax.dot_general(q, k, (((2,), (2,)), ((0,), (0,))),
                            preferred_element_type=jnp.float32)              # (Bt,N,N)

        # softmax in f32; keep p UNNORMALIZED for the p@v matmul and
        # normalize the much smaller (Bt,N,hd) head output instead.
        s = s - jnp.max(s, axis=-1, keepdims=True)
        p = jnp.exp(s)
        l = jnp.sum(p, axis=-1, keepdims=True)                               # (Bt,N,1)

        oh = lax.dot_general(p.astype(jnp.bfloat16), v,
                             (((2,), (1,)), ((0,), (0,))),
                             preferred_element_type=jnp.float32)             # (Bt,N,hd)
        oh = oh * pl.reciprocal(l, approx=True)                              # EUP slot

        # fused output projection for this head: (Bt*N,hd) @ (hd,C), f32 acc.
        oh2d = oh.astype(jnp.bfloat16).reshape(Bt * N, hd)
        yh = jnp.dot(oh2d, wproj_ref[h], preferred_element_type=jnp.float32)
        y = yh if y is None else y + yh

    # ---- bias + write -------------------------------------------------------
    y = y + bproj_ref[...]
    o_ref[...] = y.reshape(Bt, N, C).astype(o_ref.dtype)


# ----------------------------------------------------------------------------
# Host-side parameter preparation (do once per model, not per forward call)
# ----------------------------------------------------------------------------
def prepare_self_attention_params(wqkv, wproj, bproj, *, heads, qk_scale=None):
    """Fold the softmax scale into the q rows of Wqkv, transpose to (in, out)
    layout, split Wproj^T into per-head row blocks, and cast matmul operands
    to bf16 (f32 accumulation happens in-kernel)."""
    C = wproj.shape[0]
    assert C % heads == 0, "dim must be divisible by heads"
    hd = C // heads
    scale = qk_scale if qk_scale is not None else float(hd) ** (-0.5)

    wqkv = jnp.asarray(wqkv, jnp.float32)                 # torch layout (3C, C)
    wqkv_scaled = jnp.concatenate([wqkv[:C] * scale, wqkv[C:]], axis=0)
    wqkv_t = wqkv_scaled.T.astype(jnp.bfloat16)           # (C, 3C)

    # Wproj^T (C_in, C_out) split along C_in into per-head (hd, C) blocks.
    wproj_hhd = (jnp.asarray(wproj, jnp.float32).T
                 .reshape(heads, hd, C).astype(jnp.bfloat16))
    bproj_2d = jnp.asarray(bproj, jnp.float32).reshape(1, C)
    return wqkv_t, wproj_hhd, bproj_2d


# ----------------------------------------------------------------------------
# Tiling heuristics (generation-aware)
# ----------------------------------------------------------------------------
def _per_step_vmem_bytes(Bt, N, C, x_itemsize, out_itemsize):
    slab_in = 2 * Bt * N * C * x_itemsize            # double-buffered input slab
    slab_out = 2 * Bt * N * C * out_itemsize         # double-buffered output slab
    qkv = Bt * N * 3 * C * 4                         # f32 qkv activations
    scores = Bt * N * N * 6                          # f32 scores + bf16 copy (1 head live)
    y_acc = Bt * N * C * 4                           # f32 projection accumulator
    weights = 2 * (C * 3 * C * 2 + C * C * 2 + 4 * C)
    return slab_in + slab_out + qkv + scores + y_acc + weights


def _pick_block_batch(B, N, C, x_itemsize, out_itemsize, vmem_budget):
    best = 1
    for d in range(1, B + 1):
        if B % d:
            continue
        # Keep >= 2 grid steps when possible: v7x has 2 TensorCores sharded
        # over the "parallel" axis, and a length-1 grid defeats pipelining.
        if B >= 2 and B // d < 2:
            continue
        if _per_step_vmem_bytes(d, N, C, x_itemsize, out_itemsize) > vmem_budget:
            continue
        if best * N >= 512:
            break                                    # slab already fills MXU M; stop growing
        best = d
    return best


def _vmem_capacity_bytes():
    try:
        return int(pltpu.get_tpu_info().vmem_capacity_bytes)
    except Exception:
        return 64 * 1024 * 1024                      # conservative (v7x per-TC)


# ----------------------------------------------------------------------------
# Wrappers
# ----------------------------------------------------------------------------
def self_attention_pallas_seq(x_seq, params, *, heads, block_batch=None):
    """x_seq: (B, N, C).  params from prepare_self_attention_params."""
    wqkv_t, wproj_hhd, bproj_2d = params
    B, N, C = x_seq.shape
    assert C % heads == 0, "dim must be divisible by heads"
    hd = C // heads

    vmem_cap = _vmem_capacity_bytes()
    vmem_budget = max(16 * 1024 * 1024, vmem_cap - 16 * 1024 * 1024)
    # ~100 MiB on v5e/v6e (128 MiB VMEM), ~48 MiB on v7x (64 MiB VMEM).
    vmem_limit = max(32 * 1024 * 1024,
                     min(vmem_cap - 16 * 1024 * 1024, 100 * 1024 * 1024))

    x_isz = x_seq.dtype.itemsize
    if block_batch is None:
        block_batch = _pick_block_batch(B, N, C, x_isz, x_isz, vmem_budget)
    Bt = block_batch
    assert B % Bt == 0, "block_batch must divide B"

    kernel = functools.partial(_self_attention_kernel, heads=heads)

    flops = (2 * B * N * C * (3 * C)              # qkv projection
             + 4 * B * heads * N * N * hd         # q.k^T and p@v
             + 2 * B * N * C * C)                 # output projection (per-head sum)
    bytes_accessed = int(2 * x_seq.size * x_isz                     # in + out
                         + 2 * wqkv_t.size + 2 * wproj_hhd.size     # bf16 weights
                         + 4 * bproj_2d.size)
    cost = pl.CostEstimate(flops=flops,
                           transcendentals=B * heads * N * N,
                           bytes_accessed=bytes_accessed)

    return pl.pallas_call(
        kernel,
        out_shape=jax.ShapeDtypeStruct((B, N, C), x_seq.dtype),
        grid_spec=pltpu.PrefetchScalarGridSpec(
            num_scalar_prefetch=0,
            grid=(B // Bt,),
            in_specs=[
                pl.BlockSpec((Bt, N, C), lambda b: (b, 0, 0)),
                pl.BlockSpec((C, 3 * C), lambda b: (0, 0)),
                pl.BlockSpec((heads, hd, C), lambda b: (0, 0, 0)),
                pl.BlockSpec((1, C), lambda b: (0, 0)),
            ],
            out_specs=pl.BlockSpec((Bt, N, C), lambda b: (b, 0, 0)),
        ),
        compiler_params=pltpu.CompilerParams(
            dimension_semantics=("parallel",),
            vmem_limit_bytes=vmem_limit,
        ),
        cost_estimate=cost,
    )(x_seq, wqkv_t, wproj_hhd, bproj_2d)


def self_attention_pallas(x_nchw, params, *, heads, block_batch=None):
    """x_nchw: (B, C, H, W).  Mirrors the PyTorch forward on a 4-D input."""
    B, C, H, W = x_nchw.shape
    N = H * W
    # Matches torch: x.permute(0,1,2,3).view(B, -1, C)  (raw row-major re-view;
    # NOTE: this mixes channel/spatial axes exactly like the original module).
    x_seq = x_nchw.reshape(B, N, C)
    out_seq = self_attention_pallas_seq(x_seq, params, heads=heads,
                                        block_batch=block_batch)
    # Matches torch: x.view(B, H, W, C).permute(0, 3, 1, 2)
    return out_seq.reshape(B, H, W, C).transpose(0, 3, 1, 2)


# ----------------------------------------------------------------------------
# Pure-JAX reference (f32 throughout), mirrors the PyTorch forward exactly.
# ----------------------------------------------------------------------------
def self_attention_ref(x_nchw, wqkv, wproj, bproj, *, heads, qk_scale=None):
    B, C, H, W = x_nchw.shape
    N = H * W
    hd = C // heads
    scale = qk_scale if qk_scale is not None else float(hd) ** (-0.5)

    x = x_nchw.reshape(B, N, C)
    qkv = x @ wqkv.T                                           # (B, N, 3C)
    qkv = qkv.reshape(B, N, 3, heads, hd).transpose(2, 0, 3, 1, 4)
    q, k, v = qkv[0], qkv[1], qkv[2]                           # (B, h, N, hd)
    attn = jnp.einsum("bhnd,bhmd->bhnm", q, k) * scale
    attn = jax.nn.softmax(attn, axis=-1)
    o = jnp.einsum("bhnm,bhmd->bhnd", attn, v)                 # (B, h, N, hd)
    o = o.transpose(0, 2, 1, 3).reshape(B, N, C)
    y = o @ wproj.T + bproj
    return y.reshape(B, H, W, C).transpose(0, 3, 1, 2)


if __name__ == "__main__":
    # Small, TPU-friendly shapes implied by the module: NCHW input.
    B, C, H, W = 2, 64, 8, 8
    heads = 2

    key = jax.random.PRNGKey(0)
    kx, kqkv, kproj, kb = jax.random.split(key, 4)

    x = jax.random.normal(kx, (B, C, H, W), dtype=jnp.float32)

    # Torch Linear layout: (out_features, in_features). qkv_bias=False per
    # module default; proj has a bias.
    wqkv = jax.random.normal(kqkv, (3 * C, C), dtype=jnp.float32) * (1.0 / np.sqrt(C))
    wproj = jax.random.normal(kproj, (C, C), dtype=jnp.float32) * (1.0 / np.sqrt(C))
    bproj = jax.random.normal(kb, (C,), dtype=jnp.float32) * 0.01
    # TODO(synk): dropout layers are identity here (dropout_rate forced to 0.0 in __init__).

    params = prepare_self_attention_params(wqkv, wproj, bproj, heads=heads)

    out = self_attention_pallas(x, params, heads=heads)
    out = jax.block_until_ready(out)

    ref = self_attention_ref(x, wqkv, wproj, bproj, heads=heads)
    # Tolerance loosened vs. pure-f32 because the matmuls run with bf16 MXU
    # operands (f32 accumulation, f32 softmax, approx EUP reciprocal).
    np.testing.assert_allclose(np.asarray(out), np.asarray(ref),
                               rtol=2.5e-2, atol=2.5e-2)

    print("KERNEL_OK")
</pallas_src>

<mosaic_0001>
module attributes {stable_mosaic.version = 11 : i64} {
  func.func @_self_attention_kernel(%arg0: i32, %arg1: memref<1x64x64xf32, #tpu.memory_space<vmem>>, %arg2: memref<64x192xbf16, #tpu.memory_space<vmem>>, %arg3: memref<2x32x64xbf16, #tpu.memory_space<vmem>>, %arg4: memref<1x64xf32, #tpu.memory_space<vmem>>, %arg5: memref<1x64x64xf32, #tpu.memory_space<vmem>>) attributes {dimension_semantics = [#tpu.dimension_semantics<parallel>], iteration_bounds = array<i64: 2>, scalar_prefetch = 0 : i64, scratch_operands = 0 : i64, tpu.core_type = #tpu.core_type<tc>, window_params = [{transform_indices = @transform_0, window_bounds = array<i64: 1, 64, 64>}, {pipeline_mode = #tpu.pipeline_mode<synchronous>, transform_indices = @transform_1, window_bounds = array<i64: 64, 192>}, {pipeline_mode = #tpu.pipeline_mode<synchronous>, transform_indices = @transform_2, window_bounds = array<i64: 2, 32, 64>}, {pipeline_mode = #tpu.pipeline_mode<synchronous>, transform_indices = @transform_3, window_bounds = array<i64: 1, 64>}, {transform_indices = @transform_4, window_bounds = array<i64: 1, 64, 64>}]} {
    %c0 = arith.constant 0 : index
    %c0_0 = arith.constant 0 : index
    %c0_1 = arith.constant 0 : index
    %0 = vector.load %arg1[%c0, %c0_0, %c0_1] : memref<1x64x64xf32, #tpu.memory_space<vmem>>, vector<1x64x64xf32>
    %1 = vector.shape_cast %0 : vector<1x64x64xf32> to vector<64x64xf32>
    %2 = arith.truncf %1 : vector<64x64xf32> to vector<64x64xbf16>
    %c0_2 = arith.constant 0 : index
    %c0_3 = arith.constant 0 : index
    %3 = vector.load %arg2[%c0_2, %c0_3] : memref<64x192xbf16, #tpu.memory_space<vmem>>, vector<64x192xbf16>
    %cst = arith.constant dense<0.000000e+00> : vector<64x192xf32>
    %4 = tpu.matmul %2, %3, %cst {dimension_numbers = #tpu.dot_dimension_numbers<[1], [0], [0], [1], [0, 0, 1, 1], [], []>} : vector<64x64xbf16>, vector<64x192xbf16>, vector<64x192xf32> -> vector<64x192xf32>
    %5 = vector.shape_cast %4 : vector<64x192xf32> to vector<1x64x192xf32>
    %6 = vector.extract_strided_slice %5 {offsets = [0, 0, 0], sizes = [1, 64, 32], strides = [1, 1, 1]} : vector<1x64x192xf32> to vector<1x64x32xf32>
    %7 = arith.truncf %6 : vector<1x64x32xf32> to vector<1x64x32xbf16>
    %8 = vector.extract_strided_slice %5 {offsets = [0, 0, 64], sizes = [1, 64, 32], strides = [1, 1, 1]} : vector<1x64x192xf32> to vector<1x64x32xf32>
    %9 = arith.truncf %8 : vector<1x64x32xf32> to vector<1x64x32xbf16>
    %10 = vector.extract_strided_slice %5 {offsets = [0, 0, 128], sizes = [1, 64, 32], strides = [1, 1, 1]} : vector<1x64x192xf32> to vector<1x64x32xf32>
    %11 = arith.truncf %10 : vector<1x64x32xf32> to vector<1x64x32xbf16>
    %cst_4 = arith.constant dense<0.000000e+00> : vector<1x64x64xf32>
    %12 = tpu.matmul %7, %9, %cst_4 {dimension_numbers = #tpu.dot_dimension_numbers<[2], [2], [1], [1], [0, 0, 0, 1, 1, 1], [0], [0]>} : vector<1x64x32xbf16>, vector<1x64x32xbf16>, vector<1x64x64xf32> -> vector<1x64x64xf32>
    %cst_5 = arith.constant dense<0xFF800000> : vector<1x64xf32>
    %13 = vector.multi_reduction <maximumf>, %12, %cst_5 [2] : vector<1x64x64xf32> to vector<1x64xf32>
    %14 = vector.shape_cast %13 : vector<1x64xf32> to vector<1x64x1xf32>
    %15 = vector.broadcast %14 : vector<1x64x1xf32> to vector<1x64x64xf32>
    %16 = arith.subf %12, %15 : vector<1x64x64xf32>
    %17 = math.exp %16 : vector<1x64x64xf32>
    %cst_6 = arith.constant dense<0.000000e+00> : vector<1x64xf32>
    %18 = vector.multi_reduction <add>, %17, %cst_6 [2] : vector<1x64x64xf32> to vector<1x64xf32>
    %19 = vector.shape_cast %18 : vector<1x64xf32> to vector<1x64x1xf32>
    %20 = arith.truncf %17 : vector<1x64x64xf32> to vector<1x64x64xbf16>
    %cst_7 = arith.constant dense<0.000000e+00> : vector<1x64x32xf32>
    %21 = tpu.matmul %20, %11, %cst_7 {dimension_numbers = #tpu.dot_dimension_numbers<[2], [1], [1], [2], [0, 0, 0, 1, 1, 2], [0], [0]>} : vector<1x64x64xbf16>, vector<1x64x32xbf16>, vector<1x64x32xf32> -> vector<1x64x32xf32>
    %22 = tpu.reciprocal %19 {approx = true} : vector<1x64x1xf32> -> vector<1x64x1xf32>
    %23 = vector.broadcast %22 : vector<1x64x1xf32> to vector<1x64x32xf32>
    %24 = arith.mulf %21, %23 : vector<1x64x32xf32>
    %25 = arith.truncf %24 : vector<1x64x32xf32> to vector<1x64x32xbf16>
    %26 = vector.shape_cast %25 : vector<1x64x32xbf16> to vector<64x32xbf16>
    %c0_8 = arith.constant 0 : index
    %c0_9 = arith.constant 0 : index
    %c0_10 = arith.constant 0 : index
    %27 = vector.load %arg3[%c0_8, %c0_9, %c0_10] : memref<2x32x64xbf16, #tpu.memory_space<vmem>>, vector<1x32x64xbf16>
    %28 = vector.shape_cast %27 : vector<1x32x64xbf16> to vector<32x64xbf16>
    %cst_11 = arith.constant dense<0.000000e+00> : vector<64x64xf32>
    %29 = tpu.matmul %26, %28, %cst_11 {dimension_numbers = #tpu.dot_dimension_numbers<[1], [0], [0], [1], [0, 0, 1, 1], [], []>} : vector<64x32xbf16>, vector<32x64xbf16>, vector<64x64xf32> -> vector<64x64xf32>
    %30 = vector.extract_strided_slice %5 {offsets = [0, 0, 32], sizes = [1, 64, 32], strides = [1, 1, 1]} : vector<1x64x192xf32> to vector<1x64x32xf32>
    %31 = arith.truncf %30 : vector<1x64x32xf32> to vector<1x64x32xbf16>
    %32 = vector.extract_strided_slice %5 {offsets = [0, 0, 96], sizes = [1, 64, 32], strides = [1, 1, 1]} : vector<1x64x192xf32> to vector<1x64x32xf32>
    %33 = arith.truncf %32 : vector<1x64x32xf32> to vector<1x64x32xbf16>
    %34 = vector.extract_strided_slice %5 {offsets = [0, 0, 160], sizes = [1, 64, 32], strides = [1, 1, 1]} : vector<1x64x192xf32> to vector<1x64x32xf32>
    %35 = arith.truncf %34 : vector<1x64x32xf32> to vector<1x64x32xbf16>
    %cst_12 = arith.constant dense<0.000000e+00> : vector<1x64x64xf32>
    %36 = tpu.matmul %31, %33, %cst_12 {dimension_numbers = #tpu.dot_dimension_numbers<[2], [2], [1], [1], [0, 0, 0, 1, 1, 1], [0], [0]>} : vector<1x64x32xbf16>, vector<1x64x32xbf16>, vector<1x64x64xf32> -> vector<1x64x64xf32>
    %cst_13 = arith.constant dense<0xFF800000> : vector<1x64xf32>
    %37 = vector.multi_reduction <maximumf>, %36, %cst_13 [2] : vector<1x64x64xf32> to vector<1x64xf32>
    %38 = vector.shape_cast %37 : vector<1x64xf32> to vector<1x64x1xf32>
    %39 = vector.broadcast %38 : vector<1x64x1xf32> to vector<1x64x64xf32>
    %40 = arith.subf %36, %39 : vector<1x64x64xf32>
    %41 = math.exp %40 : vector<1x64x64xf32>
    %cst_14 = arith.constant dense<0.000000e+00> : vector<1x64xf32>
    %42 = vector.multi_reduction <add>, %41, %cst_14 [2] : vector<1x64x64xf32> to vector<1x64xf32>
    %43 = vector.shape_cast %42 : vector<1x64xf32> to vector<1x64x1xf32>
    %44 = arith.truncf %41 : vector<1x64x64xf32> to vector<1x64x64xbf16>
    %cst_15 = arith.constant dense<0.000000e+00> : vector<1x64x32xf32>
    %45 = tpu.matmul %44, %35, %cst_15 {dimension_numbers = #tpu.dot_dimension_numbers<[2], [1], [1], [2], [0, 0, 0, 1, 1, 2], [0], [0]>} : vector<1x64x64xbf16>, vector<1x64x32xbf16>, vector<1x64x32xf32> -> vector<1x64x32xf32>
    %46 = tpu.reciprocal %43 {approx = true} : vector<1x64x1xf32> -> vector<1x64x1xf32>
    %47 = vector.broadcast %46 : vector<1x64x1xf32> to vector<1x64x32xf32>
    %48 = arith.mulf %45, %47 : vector<1x64x32xf32>
    %49 = arith.truncf %48 : vector<1x64x32xf32> to vector<1x64x32xbf16>
    %50 = vector.shape_cast %49 : vector<1x64x32xbf16> to vector<64x32xbf16>
    %c1 = arith.constant 1 : index
    %c0_16 = arith.constant 0 : index
    %c0_17 = arith.constant 0 : index
    %51 = vector.load %arg3[%c1, %c0_16, %c0_17] : memref<2x32x64xbf16, #tpu.memory_space<vmem>>, vector<1x32x64xbf16>
    %52 = vector.shape_cast %51 : vector<1x32x64xbf16> to vector<32x64xbf16>
    %cst_18 = arith.constant dense<0.000000e+00> : vector<64x64xf32>
    %53 = tpu.matmul %50, %52, %cst_18 {dimension_numbers = #tpu.dot_dimension_numbers<[1], [0], [0], [1], [0, 0, 1, 1], [], []>} : vector<64x32xbf16>, vector<32x64xbf16>, vector<64x64xf32> -> vector<64x64xf32>
    %54 = arith.addf %29, %53 : vector<64x64xf32>
    %c0_19 = arith.constant 0 : index
    %c0_20 = arith.constant 0 : index
    %55 = vector.load %arg4[%c0_19, %c0_20] : memref<1x64xf32, #tpu.memory_space<vmem>>, vector<1x64xf32>
    %56 = vector.broadcast %55 : vector<1x64xf32> to vector<64x64xf32>
    %57 = arith.addf %54, %56 : vector<64x64xf32>
    %58 = vector.shape_cast %57 : vector<64x64xf32> to vector<1x64x64xf32>
    %c0_21 = arith.constant 0 : index
    %c0_22 = arith.constant 0 : index
    %c0_23 = arith.constant 0 : index
    %59 = vector.load %arg5[%c0_21, %c0_22, %c0_23] : memref<1x64x64xf32, #tpu.memory_space<vmem>>, vector<1x64x64xf32>
    tpu.vector_store %arg5[%c0_21, %c0_22, %c0_23], %58 {strides = array<i32>} : memref<1x64x64xf32, #tpu.memory_space<vmem>>, vector<1x64x64xf32>,
    return
  }
  func.func @transform_0(%arg0: i32) -> (i32, i32, i32) {
    %c0_i32 = arith.constant 0 : i32
    %c0_i32_0 = arith.constant 0 : i32
    %c0_i32_1 = arith.constant 0 : i32
    return %arg0, %c0_i32, %c0_i32_0 : i32, i32, i32
  }
  func.func @transform_1(%arg0: i32) -> (i32, i32) {
    %c0_i32 = arith.constant 0 : i32
    %c0_i32_0 = arith.constant 0 : i32
    %c0_i32_1 = arith.constant 0 : i32
    return %c0_i32, %c0_i32_0 : i32, i32
  }
  func.func @transform_2(%arg0: i32) -> (i32, i32, i32) {
    %c0_i32 = arith.constant 0 : i32
    %c0_i32_0 = arith.constant 0 : i32
    %c0_i32_1 = arith.constant 0 : i32
    %c0_i32_2 = arith.constant 0 : i32
    return %c0_i32, %c0_i32_0, %c0_i32_1 : i32, i32, i32
  }
  func.func @transform_3(%arg0: i32) -> (i32, i32) {
    %c0_i32 = arith.constant 0 : i32
    %c0_i32_0 = arith.constant 0 : i32
    %c0_i32_1 = arith.constant 0 : i32
    return %c0_i32, %c0_i32_0 : i32, i32
  }
  func.func @transform_4(%arg0: i32) -> (i32, i32, i32) {
    %c0_i32 = arith.constant 0 : i32
    %c0_i32_0 = arith.constant 0 : i32
    %c0_i32_1 = arith.constant 0 : i32
    return %arg0, %c0_i32, %c0_i32_0 : i32, i32, i32
  }
}

</mosaic_0001>

<bundles_post_ra>
// kernel: tpu_custom_call.1
= control target key start
LH: loop header
LB: loop body
LE: loop exit
PB: predicated region body
PF: predicated region fallthrough
CT: control target
= control target key end

     0   :  { %9 = vsyncpa [#allocation3], 0  ;;  %s2211_s0 = inlined_call_operand.hbm [shape: f32[2,64,64], index: 0, kind: input, shape index: {}]   ;;  %s2212_s1 = inlined_call_operand.hbm [shape: bf16[64,192], index: 1, kind: input, shape index: {}]   ;;  %s2213_s2 = inlined_call_operand.hbm [shape: bf16[2,32,64], index: 2, kind: input, shape index: {}]   ;;  %s2214_s3 = inlined_call_operand.vmem [shape: f32[1,64], index: 3, kind: input, shape index: {}]   ;;  %s2215_s4 = inlined_call_operand.hbm [shape: f32[2,64,64], index: 4, kind: output, shape index: {}]  }
   0x1   :  { %11 = vsyncpa [#allocation3 + $0x1], 0 }
   0x2   :  { %12 = vsyncpa [#allocation6], 0 }
   0x3   :  { %13 = vsyncpa [#allocation4], 0 }
   0x4   :  { %15 = vsyncpa [#allocation4 + $0x1], 0  ;;  %s1832_s15 = smov 0   ;;  %s1834_s16 = smov 0  }
   0x5   :  { %s1836_s17 = smov 0   ;;  %s1838_s18 = smov 0  }
   0x6 LB: > { %s1853_s19 = sadd.s32 4294967295, %s1791_s18   ;;  %s1285_s20 = sadd.s32 4294967294, %s1791_s18   ;;  %s1791_s18 = sphi %s1838_s18, %s2236_s18   ;;  %s1787_s17 = sphi %s1836_s17, %s2235_s17   ;;  %s1783_s16 = sphi %s1834_s16, %s2234_s16   ;;  %s1779_s15 = sphi %s1832_s15, %s2233_s15  }
   0x7   : > { %p41_p0 = scmp.ne.s32.totalorder %s1783_s16, %s1779_s15  ;;  %p2216_p1 = scmp.eq.s32.totalorder %s1853_s19, 0 }
   0x8   : > { %p128_p2 = scmp.eq.s32.totalorder %s1853_s19, 1  ;;  %p134_p3 = scmp.eq.s32.totalorder %s1285_s20, 1 }
   0x9   : > { %p1862_p4 = por %p2216_p1, %p41_p0  ;;  %p1286_p5 = scmp.ge.s32.totalorder %s1791_s18, 1 }
   0xa   : > { %p1867_p6 = por %p134_p3, %p41_p0  ;;  %p141_p7 = scmp.lt.s32.totalorder %s1791_s18, 3 }
   0xb   : > { %s2220_s21 = scalar_select %p1862_p4, 1, 0 }
   0xc   : > { %s2221_s22 = scalar_select %p1867_p6, 1, 0 }
   0xd   : > { %p1872_p8 = pnand %p1286_p5, %p141_p7  ;;  %s1793_s24 = smov [#allocation5]  }
   0xe   : > { %s153_s25 = sshll.u32 %s1793_s24, 4  ;;  %s1794_s27 = smov [#allocation7]   ;;  %s154_s25 = int_to_ptr.vmem [resolvable:$true] %s153_s25 }
   0xf   : > { %s2222_s23 = scalar_select %p1872_p8, 1, 0 }
  0x10   : > { %p1498_p9 = pneg %p1872_p8  ;;  %s166_s28 = sshll.u32 %s1794_s27, 4  ;;  %s167_s28 = int_to_ptr.vmem [resolvable:$true] %s166_s28 }
  0x11   : > { %s1654_s29 = scalar_lea.vmem %s154_s25, 1024  ;;  %p1662_p5 = scmp.lt.s32.totalorder %s154_s25, %s154_s25 }
  0x12   : > { %p1881_p11 = pnand %p1498_p9, %p2216_p1  ;;  %p1655_p13 = scmp.ne.s32.totalorder %s154_s25, %s1654_s29 }
  0x13   : > { %p1663_p7 = scmp.lt.s32.totalorder %s1654_s29, %s1654_s29 }
  0x14   : > { %p1645_p12 = pneg %p1881_p11 }
  0x15   : > { %p1664_p10 = por %p1663_p7, %p1662_p5 }
  0x16   : > { %p1657_p0 = pnand %p1655_p13, %p1645_p12 }
  0x18   : > { %p1658_p3 = pneg %p1657_p0 }
  0x1a   : > { %p1665_p9 = pnand %p1664_p10, %p1658_p3 }
  0x1c   : > { %1668 = shalt.err (!%p1665_p9)
}
  0x1d   : > { %s1795_s30 = smov 128   ;;  %s1796_s5 = smov 8  }
  0x1e   : > { %1501 = dma.hbm_to_vmem [thread:$0]  (!%p1881_p11), %s2212_s1, 1024, %s154_s25, [#allocation6], %s1795_s30, %s1795_s30, %s1796_s5  }
  0x1f   : > { %s1680_s8 = scalar_lea.vmem %s167_s28, 512  ;;  %p1688_p10 = scmp.lt.s32.totalorder %s167_s28, %s167_s28 }
  0x20   : > { %p1681_p13 = scmp.ne.s32.totalorder %s167_s28, %s1680_s8  ;;  %p1689_p3 = scmp.lt.s32.totalorder %s1680_s8, %s1680_s8 }
  0x22   : > { %p1683_p0 = pnand %p1681_p13, %p1645_p12  ;;  %p1690_p7 = por %p1689_p3, %p1688_p10 }
  0x24   : > { %p1684_p5 = pneg %p1683_p0 }
  0x26   : > { %p1691_p9 = pnand %p1690_p7, %p1684_p5 }
  0x28   : > { %1694 = shalt.err (!%p1691_p9)
}
  0x29   : > { %s1797_s9 = smov 64   ;;  %s1798_s10 = smov 4  }
  0x2a   : > { %1504 = dma.hbm_to_vmem [thread:$0]  (!%p1881_p11), %s2213_s2, 512, %s167_s28, [#allocation6], %s1797_s9, %s1797_s9, %s1798_s10  }
  0x2b   : > { %s1907_s13 = sadd.s32 1, %s1791_s18   ;;  %s28_s20 = sadd.s32 1, %s1787_s17 }
  0x2c   : > { %s25_s14 = ssub.s32 %s1791_s18, %s1907_s13  ;;  %p35_p13 = scmp.ne.s32.totalorder %s1787_s17, %s1783_s16 }
  0x2d   : > { %p26_p12 = scmp.eq.s32.totalorder %s25_s14, 0  ;;  %p36_p0 = scmp.eq.s32.totalorder %s1791_s18, 0 }
  0x2e   : > { %p1920_p10 = por %p128_p2, %p35_p13  ;;  %p1515_p3 = scmp.lt.s32.totalorder %s1791_s18, 2 }
  0x2f   : > { %s1916_s24 = scalar_select %p26_p12, %s1787_s17, %s28_s20  }
  0x30   : > { %p37_p5 = por %p36_p0, %p35_p13  ;;  %s183_s26 = sand.u32 1, %s1787_s17  }
  0x31   : > { %s2224_s25 = scalar_select %p1920_p10, 1, 0 }
  0x32   : > { %s1290_s27 = sshll.u32 %s183_s26, 6  ;;  %s1344_s28 = sshll.u32 %s1791_s18, 10 }
  0x33   : > { %s1930_s7 = scalar_lea.hbm %s2211_s0, %s1344_s28  ;;  %s187_s8 = scalar_lea.vmem [#allocation2], %s1290_s27 }
  0x34   : > { %s194_s9 = sshll.u32 %s187_s8, 4  ;;  %p1934_p2 = pnand %p1515_p3, %p37_p5  ;;  %s1932_s9 = int_to_ptr.vmem [resolvable:$true] %s194_s9 }
  0x35   : > { %s1938_s11 = scalar_lea.sflag [#allocation3], %s183_s26  ;;  %s1695_s12 = scalar_lea.hbm %s1930_s7, 1024 }
  0x36   : > { %p1696_p11 = scmp.ne.s32.totalorder %s1930_s7, %s1695_s12  ;;  %p1697_p7 = pneg %p1934_p2 }
  0x37   : > { %s1700_s27 = scalar_lea.hbm %s2211_s0, 2048  ;;  %p1701_p13 = scmp.lt.s32.totalorder %s1930_s7, %s2211_s0 }
  0x38   : > { %p1698_p9 = pnand %p1697_p7, %p1696_p11  ;;  %p1702_p0 = scmp.lt.s32.totalorder %s1700_s27, %s1695_s12 }
  0x3a   : > { %p1699_p12 = pneg %p1698_p9  ;;  %p1703_p5 = por %p1702_p0, %p1701_p13 }
  0x3c   : > { %p1704_p3 = pnand %p1703_p5, %p1699_p12 }
  0x3e   : > { %1707 = shalt.err (!%p1704_p3)
}
  0x3f   : > { %s1708_s26 = scalar_lea.vmem %s1932_s9, 1024  ;;  %s1799_s6 = smov [#allocation2]  }
  0x40   : > { %p1709_p1 = scmp.ne.s32.totalorder %s1932_s9, %s1708_s26  ;;  %s1713_s8 = sshll.u32 %s1799_s6, 4  ;;  %s1714_s8 = int_to_ptr.vmem [resolvable:$false] %s1713_s8 }
  0x41   : > { %s1715_s14 = scalar_lea.vmem %s1714_s8, 2048  ;;  %p1716_p9 = scmp.lt.s32.totalorder %s1932_s9, %s1714_s8 }
  0x42   : > { %p1711_p6 = pnand %p1709_p1, %p1697_p7  ;;  %p1717_p10 = scmp.lt.s32.totalorder %s1715_s14, %s1708_s26 }
  0x44   : > { %p1712_p11 = pneg %p1711_p6  ;;  %p1718_p4 = por %p1717_p10, %p1716_p9 }
  0x46   : > { %p1719_p8 = pnand %p1718_p4, %p1712_p11 }
  0x48   : > { %1722 = shalt.err (!%p1719_p8)
}
  0x49   : > { %1508 = dma.hbm_to_vmem [thread:$0]  (!%p1934_p2), %s1930_s7, 1024, %s1932_s9, %s1938_s11, %s1795_s30, %s1795_s30, %s1796_s5  }
  0x4a   : > { %p2226_p1 = scmp.ne.s32.totalorder %s2222_s23, 0 }
  0x4b   : > { %s1965_s12 = sand.u32 (!%p2226_p1), 1, %s1783_s16   ;;  %p2227_p4 = scmp.ne.s32.totalorder (!%p2226_p1), %s2220_s21, 0 }
  0x4c   : > { %206 = sbr.rel (%p2226_p1) target bundleno = 1297 (0x511), region = 36  ;;  %s1294_s20 = sshll.u32 (!%p2226_p1), %s1965_s12, 6 }
  0x4d   : > { %s209_s27 = scalar_lea.sflag (!%p2226_p1), [#allocation3], %s1965_s12  ;;  %s1971_s10 = scalar_lea.vmem (!%p2226_p1), [#allocation2], %s1294_s20 }
  0x51   : > { %1766 = dma.done.wait (%p2227_p4), %s209_s27, 1024  }
  0x52   : > { %1768 = vsyncadd (%p2227_p4), %s209_s27, 4294966272  ;;  %p2228_p6 = scmp.eq.s32.totalorder %s1853_s19, 0 }
  0x54   : > { %1770 = dma.done.wait (%p2228_p6), [#allocation6], 1536   ;;  %p2229_p8 = pmov %p2228_p6 }
  0x55   : > { %v1800_v0 = vmov 0   ;;  %v1563_v1 = vld [vmem:[#allocation5 + $0x34] ss:$8 sps:$4 sm:$0xff]   ;;  %v1565_v2 = vld [vmem:[#allocation5 + $0x30] ss:$8 sps:$4 sm:$0xff]   ;;  %v246_v9 = vld [vmem:[%s1971_s10] sm:$0xff] }
  0x56   : > { %1772 = vsyncadd (%p2229_p8), [#allocation6], 4294965760  ;;  %351 = vmatprep.mubr.bf16.mxu0 %v1800_v0  ;;  %327 = vmatprep.subr.bf16.mxu0 %v1563_v1  ;;  %v1566_v3 = vld [vmem:[#allocation5 + $0x24] ss:$8 sps:$4 sm:$0xff]   ;;  %v1568_v4 = vld [vmem:[#allocation5 + $0x20] ss:$8 sps:$4 sm:$0xff]  }
  0x57   : > { %328 = vmatpush1.bf16.msra.mxu0 %v1565_v2  ;;  %v1569_v5 = vld [vmem:[#allocation5 + $0x14] ss:$8 sps:$4 sm:$0xff]   ;;  %v1571_v6 = vld [vmem:[#allocation5 + $0x10] ss:$8 sps:$4 sm:$0xff]   ;;  %v1572_v7 = vld [vmem:[#allocation5 + $0x4] ss:$8 sps:$4 sm:$0xff]  }
  0x58   : > { %329 = vmatprep.subr.bf16.mxu0 %v1566_v3  ;;  %v1574_v8 = vld [vmem:[#allocation5] ss:$8 sps:$4 sm:$0xff]   ;;  %vm306_vm0 = vcmask 523264   ;;  %v248_v12 = vld [vmem:[%s1971_s10 + $0x10] sm:$0xff]  ;;  %v249_v13 = vld [vmem:[%s1971_s10 + $0x18] sm:$0xff]  ;;  %vm412_vm1 = vcmask 261120  }
  0x59   : > { %v247_v10 = vld [vmem:[%s1971_s10 + $0x8] sm:$0xff]  ;;  %v255_v14 = vpack.c.bf16 %v249_v13, %v248_v12  ;;  %v250_v15 = vld [vmem:[%s1971_s10 + $0x20] sm:$0xff]  ;;  %v252_v18 = vld [vmem:[%s1971_s10 + $0x30] sm:$0xff]  ;;  %s1801_s21 = smov 64   ;;  %s1802_s23 = smov 32  }
  0x5a   : > { %v254_v11 = vpack.c.bf16 %v247_v10, %v246_v9  ;;  %v251_v16 = vld [vmem:[%s1971_s10 + $0x28] sm:$0xff]  ;;  %v253_v19 = vld [vmem:[%s1971_s10 + $0x38] sm:$0xff]  ;;  %s1803_s30 = smov 96   ;;  %s2143_s9 = scalar_lea.vmem [#allocation8], %s1294_s20 }
  0x5b   : > { %330 = vmatpush1.bf16.msra.mxu0 %v1568_v4  ;;  %v256_v17 = vpack.c.bf16 %v251_v16, %v250_v15  ;;  %v257_v20 = vpack.c.bf16 %v253_v19, %v252_v18  ;;  %s1345_s11 = sshll.u32 %s1853_s19, 10  ;;  %s1193_s28 = sshll.u32 %s2143_s9, 4  ;;  %s2164_s28 = int_to_ptr.vmem [resolvable:$true] %s1193_s28 }
  0x5c   : > { %331 = vmatprep.subr.bf16.mxu0 %v1569_v5  ;;  %s2162_s6 = scalar_lea.hbm %s2215_s4, %s1345_s11  ;;  %s1180_s19 = scalar_lea.sflag [#allocation4], %s1965_s12 }
  0x5d   : > { %s1723_s8 = scalar_lea.vmem %s2164_s28, 1024  ;;  %p2230_p2 = scmp.ne.s32.totalorder %s2224_s25, 0 }
  0x5e   : > { %p1724_p10 = scmp.ne.s32.totalorder %s2164_s28, %s1723_s8  ;;  %s1804_s14 = smov [#allocation8]  }
  0x5f   : > { %332 = vmatpush1.bf16.msra.mxu0 %v1571_v6  ;;  %s1727_s20 = sshll.u32 %s1804_s14, 4  ;;  %s1728_s20 = int_to_ptr.vmem [resolvable:$false] %s1727_s20 }
  0x60   : > { %333 = vmatprep.subr.bf16.mxu0 %v1572_v7  ;;  %p1725_p7 = pnand %p1724_p10, %p2230_p2  ;;  %s1729_s27 = scalar_lea.vmem %s1728_s20, 2048 }
  0x61   : > { %p1730_p13 = scmp.lt.s32.totalorder %s2164_s28, %s1728_s20  ;;  %p1731_p0 = scmp.lt.s32.totalorder %s1729_s27, %s1723_s8 }
  0x62   : > { %p1726_p12 = pneg %p1725_p7 }
  0x63   : > { %334 = vmatpush1.bf16.msra.mxu0 %v1574_v8  ;;  %p1732_p5 = por %p1731_p0, %p1730_p13 }
  0x65   : > { %p1733_p3 = pnand %p1732_p5, %p1726_p12 }
  0x66   : > { %1306 = vmatmul.mubr.msk.bf16.vlgmr.msra.gmra.mxu0 %vm306_vm0, %v254_v11 }
  0x67   : > { %361 = vmatprep.mubr.bf16.mxu0 %v1800_v0 }
  0x6e   : > { %1307 = vmatmul.mubr.msk.bf16.gmra.mxu0 %vm306_vm0, %v255_v14 }
  0x6f   : > { %371 = vmatprep.mubr.bf16.mxu0 %v1800_v0 }
  0x76   : > { %1308 = vmatmul.mubr.msk.bf16.gmra.mxu0 %vm306_vm0, %v256_v17 }
  0x77   : > { %381 = vmatprep.mubr.bf16.mxu0 %v1800_v0 }
  0x7e   : > { %1309 = vmatmul.mubr.msk.bf16.gmra.mxu0 %vm306_vm0, %v257_v20 }
 0x126   : > { %v353_v21 = vpop.f32.mrf.mxu0 }
 0x128   : > { %v355_v22 = vpop.f32.mrf.mxu0 }
 0x12a   : > { %v357_v23 = vpop.f32.mrf.mxu0 }
 0x12b   : > { %v392_v24 = vpack.c.bf16 %v357_v23, %v353_v21 }
 0x12c   : > { %v359_v25 = vpop.f32.mrf.mxu0 }
 0x12d   : > { %1398 = vmatprep.mubr.msk.bf16.mxu1 %vm412_vm1, %v392_v24  ;;  %v2008_v44 = vpack.c.bf16 %v359_v25, %v355_v22 }
 0x12e   : > { %v363_v26 = vpop.f32.mrf.mxu0 }
 0x130   : > { %v365_v27 = vpop.f32.mrf.mxu0 }
 0x132   : > { %v367_v28 = vpop.f32.mrf.mxu0 }
 0x133   : > { %v1994_v29 = vpack.c.bf16 %v367_v28, %v363_v26 }
 0x134   : > { %v369_v30 = vpop.f32.mrf.mxu0 }
 0x135   : > { %406 = vrot.lane.b32.xlu1 %v1994_v29, %s1801_s21  ;;  %v2003_v43 = vpack.c.bf16 %v369_v30, %v365_v27 }
 0x136   : > { %v373_v31 = vpop.f32.mrf.mxu0 }
 0x138   : > { %v375_v32 = vpop.f32.mrf.mxu0 }
 0x139   : > { %404 = vrot.lane.b32.xlu1 %v392_v24, %s1801_s21 }
 0x13a   : > { %v377_v33 = vpop.f32.mrf.mxu0 }
 0x13b   : > { %v394_v34 = vpack.c.bf16 %v377_v33, %v373_v31 }
 0x13c   : > { %v379_v35 = vpop.f32.mrf.mxu0 }
 0x13d   : > { %691 = vrot.lane.b32.xlu1 %v394_v34, %s1802_s23  ;;  %v1999_v42 = vpack.c.bf16 %v379_v35, %v375_v32 }
 0x13e   : > { %v383_v36 = vpop.f32.mrf.mxu0 }
 0x140   : > { %v385_v37 = vpop.f32.mrf.mxu0 }
 0x141   : > { %687 = vrot.lane.b32.xlu1 %v392_v24, %s1802_s23 }
 0x142   : > { %v387_v38 = vpop.f32.mrf.mxu0 }
 0x143   : > { %v395_v39 = vpack.c.bf16 %v387_v38, %v383_v36 }
 0x144   : > { %v389_v40 = vpop.f32.mrf.mxu0 }
 0x145   : > { %v399_v41 = vpack.c.bf16 %v389_v40, %v385_v37  ;;  %681 = vrot.lane.b32.xlu1 %v1994_v29, %s1803_s30  ;;  %410 = vrot.lane.b32.xlu0 %v395_v39, %s1801_s21 }
 0x147   : > { %1406 = vmatprep.subr.bf16.mxu0 %v399_v41 }
 0x148   : > { %1407 = vmatpush3.bf16.msra.mxu0 %v399_v41 }
 0x149   : > { %685 = vrot.lane.b32.xlu1 %v395_v39, %s1803_s30  ;;  %408 = vrot.lane.b32.xlu0 %v394_v34, %s1801_s21 }
 0x14a   : > { %1408 = vmatprep.subr.bf16.mxu0 %v1999_v42 }
 0x14c   : > { %1409 = vmatpush3.bf16.msra.mxu0 %v1999_v42 }
 0x14d   : > { %693 = vrot.lane.b32.xlu0 %v395_v39, %s1802_s23  ;;  %870 = vrot.lane.b32.xlu1 %v399_v41, %s1803_s30 }
 0x14e   : > { %1410 = vmatprep.subr.bf16.mxu0 %v2003_v43 }
 0x150   : > { %1411 = vmatpush3.bf16.msra.mxu0 %v2003_v43 }
 0x151   : > { %689 = vrot.lane.b32.xlu0 %v1994_v29, %s1802_s23  ;;  %1412 = vmatprep.subr.bf16.mxu0 %v2008_v44 }
 0x154   : > { %1413 = vmatpush3.bf16.msra.mxu0 %v2008_v44 }
 0x155   : > { %679 = vrot.lane.b32.xlu0 %v392_v24, %s1803_s30 }
 0x159   : > { %683 = vrot.lane.b32.xlu0 %v394_v34, %s1803_s30 }
 0x1a7   : > { %v407_v45 = vpop.permute.xlu1 %406 }
 0x1a8   : > { %v429_v56 = vsel %vm412_vm1, %v407_v45, 0 }
 0x1ab   : > { %v405_v46 = vpop.permute.xlu1 %404 }
 0x1ac   : > { %v426_v57 = vsel %vm412_vm1, %v405_v46, 0 }
 0x1af   : > { %v692_v47 = vpop.permute.xlu1 %691 }
 0x1b0   : > { %v714_v61 = vsel %vm412_vm1, %v692_v47, 0 }
 0x1b3   : > { %v688_v48 = vpop.permute.xlu1 %687 }
 0x1b4   : > { %v708_v0 = vsel %vm412_vm1, %v688_v48, 0 }
 0x1b7   : > { %v682_v49 = vpop.permute.xlu1 %681  ;;  %v411_v50 = vpop.permute.xlu0 %410 }
 0x1b8   : > { %1478 = vmatprep.subr.msk.bf16.mxu1 %vm412_vm1, %v411_v50  ;;  %v435_v51 = vsel %vm412_vm1, %v411_v50, 0 }
 0x1b9   : > { %1391 = vmatpush3.bf16.xpose.msra.mxu1 %v435_v51 }
 0x1bb   : > { %v686_v52 = vpop.permute.xlu1 %685  ;;  %v409_v53 = vpop.permute.xlu0 %408 }
 0x1bc   : > { %1479 = vmatprep.subr.msk.bf16.mxu1 %vm412_vm1, %v409_v53  ;;  %v432_v55 = vsel %vm412_vm1, %v409_v53, 0 }
 0x1bf   : > { %v2019_v54 = vpop.permute.xlu1 %870  ;;  %v694_v58 = vpop.permute.xlu0 %693 }
 0x1c0   : > { %1438 = vmatprep.subr.bf16.mxu0 %v2019_v54  ;;  %v717_v59 = vsel %vm412_vm1, %v694_v58, 0 }
 0x1c1   : > { %1393 = vmatpush3.bf16.xpose.msra.mxu1 %v432_v55 }
 0x1c2   : > { %1480 = vmatprep.subr.msk.bf16.mxu1 %vm412_vm1, %v407_v45 }
 0x1c3   : > { %v690_v60 = vpop.permute.xlu0 %689 }
 0x1c4   : > { %v711_v63 = vsel %vm412_vm1, %v690_v60, 0 }
 0x1c7   : > { %v680_v62 = vpop.permute.xlu0 %679 }
 0x1c9   : > { %1395 = vmatpush3.bf16.xpose.msra.mxu1 %v429_v56 }
 0x1ca   : > { %1481 = vmatprep.subr.msk.bf16.mxu1 %vm412_vm1, %v405_v46 }
 0x1cb   : > { %v684_v1 = vpop.permute.xlu0 %683 }
 0x1d1   : > { %1397 = vmatpush3.bf16.xpose.msra.mxu1 %v426_v57 }
 0x1d2   : > { %1482 = vmatprep.subr.msk.bf16.mxu1 %vm412_vm1, %v694_v58 }
 0x1d8   : > { %1399 = vmatmul.mubr.msk.bf16.vlgmr.msra.gmra.mxu1 %vm412_vm1, %v1994_v29 }
 0x1d9   : > { %1402 = vmatprep.mubr.msk.bf16.mxu1 %vm412_vm1, %v394_v34  ;;  %1423 = vmatpush3.bf16.xpose.msra.mxu1 %v717_v59 }
 0x1da   : > { %1483 = vmatprep.subr.msk.bf16.mxu1 %vm412_vm1, %v692_v47 }
 0x1e0   : > { %1403 = vmatmul.mubr.msk.bf16.gmra.mxu1 %vm412_vm1, %v395_v39 }
 0x1e1   : > { %1425 = vmatpush3.bf16.xpose.msra.mxu1 %v714_v61  ;;  %1430 = vmatprep.mubr.msk.bf16.mxu1 %vm412_vm1, %v680_v62 }
 0x1e2   : > { %1484 = vmatprep.subr.msk.bf16.mxu1 %vm412_vm1, %v690_v60 }
 0x1e9   : > { %1427 = vmatpush3.bf16.xpose.msra.mxu1 %v711_v63 }
 0x1ea   : > { %1485 = vmatprep.subr.msk.bf16.mxu1 %vm412_vm1, %v688_v48 }
 0x1f1   : > { %1429 = vmatpush3.bf16.xpose.msra.mxu1 %v708_v0 }
 0x1f8   : > { %1431 = vmatmul.mubr.msk.bf16.vlgmr.msra.gmra.mxu1 %vm412_vm1, %v682_v49 }
 0x1f9   : > { %1434 = vmatprep.mubr.msk.bf16.mxu1 %vm412_vm1, %v684_v1 }
 0x200   : > { %1435 = vmatmul.mubr.msk.bf16.gmra.mxu1 %vm412_vm1, %v686_v52 }
 0x298   : > { %v1400_v2 = vpop.f32.mrf.mxu1 }
 0x299   : > { %v508_v3 = vsel %vm306_vm0, %v1400_v2, -inf }
 0x29a   : > { %509 = vmax.xlane.f32.xlu0 %v508_v3  ;;  %v471_v4 = vpop.f32.mrf.mxu1 }
 0x29b   : > { %v502_v6 = vsel %vm306_vm0, %v471_v4, -inf }
 0x29c   : > { %v1401_v5 = vpop.f32.mrf.mxu1 }
 0x29d   : > { %v511_v10 = vsel %vm306_vm0, %v1401_v5, -inf }
 0x29e   : > { %503 = vmax.xlane.f32.xlu0 %v502_v6  ;;  %v474_v7 = vpop.f32.mrf.mxu1 }
 0x29f   : > { %v505_v8 = vsel %vm306_vm0, %v474_v7, -inf }
 0x2a0   : > { %v1404_v9 = vpop.f32.mrf.mxu1  ;;  %506 = vmax.xlane.f32.xlu1 %v505_v8 }
 0x2a1   : > { %v520_v12 = vsel %vm306_vm0, %v1404_v9, -inf }
 0x2a2   : > { %512 = vmax.xlane.f32.xlu0 %v511_v10  ;;  %v2047_v11 = vpop.f32.mrf.mxu1 }
 0x2a3   : > { %v514_v16 = vsel %vm306_vm0, %v2047_v11, -inf }
 0x2a4   : > { %v1405_v13 = vpop.f32.mrf.mxu1  ;;  %521 = vmax.xlane.f32.xlu1 %v520_v12 }
 0x2a5   : > { %v523_v14 = vsel %vm306_vm0, %v1405_v13, -inf }
 0x2a6   : > { %524 = vmax.xlane.f32.xlu0 %v523_v14  ;;  %v490_v15 = vpop.f32.mrf.mxu1 }
 0x2a7   : > { %v517_v17 = vsel %vm306_vm0, %v490_v15, -inf }
 0x2a8   : > { %515 = vmax.xlane.f32.xlu1 %v514_v16 }
 0x2aa   : > { %518 = vmax.xlane.f32.xlu0 %v517_v17 }
 0x2b8   : > { %v2054_v18 = vpop.f32.mrf.mxu1 }
 0x2b9   : > { %v790_v19 = vsel %vm306_vm0, %v2054_v18, -inf }
 0x2ba   : > { %v2058_v20 = vpop.f32.mrf.mxu1  ;;  %791 = vmax.xlane.f32.xlu1 %v790_v19 }
 0x2bb   : > { %v784_v23 = vsel %vm306_vm0, %v2058_v20, -inf }
 0x2bc   : > { %v2060_v21 = vpop.f32.mrf.mxu1 }
 0x2bd   : > { %v793_v22 = vsel %vm306_vm0, %v2060_v21, -inf }
 0x2be   : > { %794 = vmax.xlane.f32.xlu0 %v793_v22  ;;  %v2066_v24 = vpop.f32.mrf.mxu1  ;;  %785 = vmax.xlane.f32.xlu1 %v784_v23 }
 0x2bf   : > { %v787_v26 = vsel %vm306_vm0, %v2066_v24, -inf }
 0x2c0   : > { %v2068_v25 = vpop.f32.mrf.mxu1 }
 0x2c1   : > { %v802_v27 = vsel %vm306_vm0, %v2068_v25, -inf }
 0x2c2   : > { %788 = vmax.xlane.f32.xlu0 %v787_v26  ;;  %v2074_v28 = vpop.f32.mrf.mxu1  ;;  %803 = vmax.xlane.f32.xlu1 %v802_v27 }
 0x2c3   : > { %v796_v31 = vsel %vm306_vm0, %v2074_v28, -inf }
 0x2c4   : > { %v2076_v29 = vpop.f32.mrf.mxu1 }
 0x2c5   : > { %v805_v30 = vsel %vm306_vm0, %v2076_v29, -inf }
 0x2c6   : > { %806 = vmax.xlane.f32.xlu0 %v805_v30  ;;  %v2082_v32 = vpop.f32.mrf.mxu1  ;;  %797 = vmax.xlane.f32.xlu1 %v796_v31 }
 0x2c7   : > { %v799_v33 = vsel %vm306_vm0, %v2082_v32, -inf }
 0x2ca   : > { %800 = vmax.xlane.f32.xlu0 %v799_v33 }
 0x2d7   : > { %866 = vrot.lane.b32.xlu1 %v2003_v43, %s1803_s30 }
 0x2db   : > { %864 = vrot.lane.b32.xlu1 %v2008_v44, %s1803_s30 }
 0x2e0   : > { %868 = vrot.lane.b32.xlu0 %v1999_v42, %s1803_s30 }
 0x323   : > { %v510_v34 = vpop.xlane.xlu0 %509 }
 0x324   : > { %v528_v35 = vsub.f32 %v1400_v2, %v510_v34 }
 0x326   : > { %v538_v36 = vmul.f32 1.442695, %v528_v35 }
 0x327   : > { %v504_v37 = vpop.xlane.xlu0 %503 }
 0x328   : > { %1579 = vpow2.f32 %v538_v36  ;;  %v526_v38 = vsub.f32 %v471_v4, %v504_v37 }
 0x329   : > { %v507_v39 = vpop.xlane.xlu1 %506 }
 0x32a   : > { %v534_v40 = vmul.f32 1.442695, %v526_v38  ;;  %v527_v41 = vsub.f32 %v474_v7, %v507_v39 }
 0x32b   : > { %v513_v45 = vpop.xlane.xlu0 %512 }
 0x32c   : > { %1581 = vpow2.f32 %v534_v40  ;;  %v536_v46 = vmul.f32 1.442695, %v527_v41  ;;  %v529_v47 = vsub.f32 %v1401_v5, %v513_v45 }
 0x32d   : > { %v522_v43 = vpop.xlane.xlu1 %521 }
 0x32e   : > { %1583 = vpow2.f32 %v536_v46  ;;  %v540_v48 = vmul.f32 1.442695, %v529_v47  ;;  %v532_v44 = vsub.f32 %v1404_v9, %v522_v43 }
 0x32f   : > { %v525_v49 = vpop.xlane.xlu0 %524 }
 0x330   : > { %1585 = vpow2.f32 %v540_v48  ;;  %v546_v42 = vmul.f32 1.442695, %v532_v44  ;;  %v533_v50 = vsub.f32 %v1405_v13, %v525_v49 }
 0x331   : > { %v516_v51 = vpop.xlane.xlu1 %515 }
 0x332   : > { %1587 = vpow2.f32 %v546_v42  ;;  %v530_v52 = vsub.f32 %v2047_v11, %v516_v51  ;;  %v548_v53 = vmul.f32 1.442695, %v533_v50 }
 0x333   : > { %v519_v55 = vpop.xlane.xlu0 %518 }
 0x334   : > { %v542_v56 = vmul.f32 1.442695, %v530_v52  ;;  %v531_v57 = vsub.f32 %v490_v15, %v519_v55 }
 0x335   : > { %v1580_v58 = vpop.eup %1579 }
 0x336   : > { %1589 = vpow2.f32 %v542_v56  ;;  %v544_v59 = vmul.f32 1.442695, %v531_v57  ;;  %v556_v60 = vsel %vm306_vm0, %v1580_v58, 0.0 }
 0x337   : > { %1591 = vpow2.f32 %v548_v53  ;;  %557 = vadd.xlane.f32.xlu1 %v556_v60 }
 0x338   : > { %1593 = vpow2.f32 %v544_v59 }
 0x339   : > { %v1582_v61 = vpop.eup %1581 }
 0x33a   : > { %v550_v62 = vsel %vm306_vm0, %v1582_v61, 0.0 }
 0x33b   : > { %v1584_v63 = vpop.eup %1583  ;;  %551 = vadd.xlane.f32.xlu0 %v550_v62  ;;  %v1575_v62 = vld [vmem:[#allocation7 + $0x8] sm:$0xff]  }
 0x33c   : > { %v553_v0 = vsel %vm306_vm0, %v1584_v63, 0.0  ;;  %v574_v1 = vpack.c.bf16 %v1584_v63, %v1582_v61  ;;  %1466 = vmatprep.subr.bf16.mxu1 %v1575_v62  ;;  %v1576_v63 = vld [vmem:[#allocation7] sm:$0xff]  }
 0x33d   : > { %v1586_v2 = vpop.eup %1585  ;;  %554 = vadd.xlane.f32.xlu1 %v553_v0  ;;  %1467 = vmatpush3.bf16.msra.mxu1 %v1575_v62  ;;  %v1577_v0 = vld [vmem:[#allocation7 + $0x18] sm:$0xff]  }
 0x33e   : > { %v575_v3 = vpack.c.bf16 %v1586_v2, %v1580_v58  ;;  %1414 = vmatprep.mubr.msk.bf16.mxu0 %vm306_vm0, %v574_v1  ;;  %v559_v4 = vsel %vm306_vm0, %v1586_v2, 0.0  ;;  %1468 = vmatprep.subr.bf16.mxu1 %v1576_v63  ;;  %v1578_v1 = vld [vmem:[#allocation7 + $0x10] sm:$0xff]  }
 0x33f   : > { %v1588_v5 = vpop.eup %1587  ;;  %560 = vadd.xlane.f32.xlu0 %v559_v4 }
 0x340   : > { %1415 = vmatmul.mubr.msk.bf16.vlgmr.msra.gmra.mxu0 %vm306_vm0, %v575_v3  ;;  %v568_v6 = vsel %vm306_vm0, %v1588_v5, 0.0 }
 0x341   : > { %1439 = vmatpush3.bf16.msra.mxu0 %v2019_v54  ;;  %569 = vadd.xlane.f32.xlu1 %v568_v6 }
 0x342   : > { %1469 = vmatpush3.bf16.msra.mxu1 %v1576_v63 }
 0x343   : > { %v1590_v7 = vpop.eup %1589  ;;  %v792_v8 = vpop.xlane.xlu1 %791 }
 0x344   : > { %v2101_v9 = vpop.eup %1591  ;;  %v810_v10 = vsub.f32 %v2054_v18, %v792_v8  ;;  %v562_v11 = vsel %vm306_vm0, %v1590_v7, 0.0 }
 0x345   : > { %v1594_v12 = vpop.eup %1593  ;;  %563 = vadd.xlane.f32.xlu1 %v562_v11  ;;  %v577_v54 = vpack.c.bf16 %v2101_v9, %v1588_v5  ;;  %v571_v56 = vsel %vm306_vm0, %v2101_v9, 0.0 }
 0x346   : > { %v820_v13 = vmul.f32 1.442695, %v810_v10  ;;  %v565_v14 = vsel %vm306_vm0, %v1594_v12, 0.0  ;;  %v576_v15 = vpack.c.bf16 %v1594_v12, %v1590_v7 }
 0x347   : > { %566 = vadd.xlane.f32.xlu0 %v565_v14  ;;  %v795_v16 = vpop.xlane.xlu0 %794  ;;  %v786_v17 = vpop.xlane.xlu1 %785 }
 0x348   : > { %1595 = vpow2.f32 %v820_v13  ;;  %v811_v19 = vsub.f32 %v2060_v21, %v795_v16  ;;  %v808_v22 = vsub.f32 %v2058_v20, %v786_v17  ;;  %1418 = vmatprep.mubr.msk.bf16.mxu0 %vm306_vm0, %v576_v15 }
 0x349   : > { %1419 = vmatmul.mubr.msk.bf16.gmra.mxu0 %vm306_vm0, %v577_v54 }
 0x34a   : > { %v816_v18 = vmul.f32 1.442695, %v808_v22  ;;  %v822_v23 = vmul.f32 1.442695, %v811_v19 }
 0x34b   : > { %v789_v26 = vpop.xlane.xlu0 %788  ;;  %v804_v27 = vpop.xlane.xlu1 %803 }
 0x34c   : > { %v809_v30 = vsub.f32 %v2066_v24, %v789_v26  ;;  %1597 = vpow2.f32 %v816_v18  ;;  %v814_v33 = vsub.f32 %v2068_v25, %v804_v27 }
 0x34d   : > { %1599 = vpow2.f32 %v822_v23 }
 0x34e   : > { %v818_v31 = vmul.f32 1.442695, %v809_v30  ;;  %v828_v36 = vmul.f32 1.442695, %v814_v33 }
 0x34f   : > { %v807_v34 = vpop.xlane.xlu0 %806  ;;  %v798_v35 = vpop.xlane.xlu1 %797 }
 0x350   : > { %1601 = vpow2.f32 %v818_v31  ;;  %v812_v20 = vsub.f32 %v2074_v28, %v798_v35  ;;  %v815_v37 = vsub.f32 %v2076_v29, %v807_v34 }
 0x352   : > { %v824_v21 = vmul.f32 1.442695, %v812_v20  ;;  %v830_v45 = vmul.f32 1.442695, %v815_v37 }
 0x353   : > { %v801_v38 = vpop.xlane.xlu0 %800  ;;  %v867_v25 = vpop.permute.xlu1 %866 }
 0x354   : > { %v813_v39 = vsub.f32 %v2082_v32, %v801_v38  ;;  %1603 = vpow2.f32 %v824_v21 }
 0x355   : > { %v1596_v40 = vpop.eup %1595  ;;  %1605 = vpow2.f32 %v828_v36 }
 0x356   : > { %v826_v24 = vmul.f32 1.442695, %v813_v39  ;;  %v838_v41 = vsel %vm306_vm0, %v1596_v40, 0.0 }
 0x357   : > { %v869_v46 = vpop.permute.xlu0 %868  ;;  %839 = vadd.xlane.f32.xlu1 %v838_v41  ;;  %v865_v43 = vpop.permute.xlu1 %864 }
 0x358   : > { %1607 = vpow2.f32 %v826_v24  ;;  %1440 = vmatprep.subr.bf16.mxu0 %v869_v46 }
 0x359   : > { %1441 = vmatpush3.bf16.msra.mxu0 %v869_v46  ;;  %v1598_v28 = vpop.eup %1597  ;;  %1609 = vpow2.f32 %v830_v45 }
 0x35a   : > { %1442 = vmatprep.subr.bf16.mxu0 %v867_v25  ;;  %v832_v29 = vsel %vm306_vm0, %v1598_v28, 0.0  ;;  %v1600_v47 = vpop.eup %1599 }
 0x35b   : > { %833 = vadd.xlane.f32.xlu0 %v832_v29  ;;  %v841_v44 = vsel %vm306_vm0, %v1600_v47, 0.0  ;;  %v857_v42 = vpack.c.bf16 %v1600_v47, %v1596_v40 }
 0x35d   : > { %v1602_v32 = vpop.eup %1601  ;;  %1443 = vmatpush3.bf16.msra.mxu0 %v867_v25 }
 0x35e   : > { %1444 = vmatprep.subr.bf16.mxu0 %v865_v43  ;;  %v856_v48 = vpack.c.bf16 %v1602_v32, %v1598_v28  ;;  %v835_v50 = vsel %vm306_vm0, %v1602_v32, 0.0 }
 0x35f   : > { %842 = vadd.xlane.f32.xlu0 %v841_v44 }
 0x360   : > { %1446 = vmatprep.mubr.msk.bf16.mxu0 %vm306_vm0, %v856_v48 }
 0x361   : > { %1445 = vmatpush3.bf16.msra.mxu0 %v865_v43  ;;  %v1604_v49 = vpop.eup %1603 }
 0x362   : > { %v844_v51 = vsel %vm306_vm0, %v1604_v49, 0.0  ;;  %v1606_v52 = vpop.eup %1605  ;;  %1454 = vmatprep.subr.bf16.mxu0 %v1577_v0 }
 0x363   : > { %836 = vadd.xlane.f32.xlu0 %v835_v50  ;;  %845 = vadd.xlane.f32.xlu1 %v844_v51  ;;  %v850_v57 = vsel %vm306_vm0, %v1606_v52, 0.0 }
 0x364   : > { %1447 = vmatmul.mubr.msk.bf16.vlgmr.msra.gmra.mxu0 %vm306_vm0, %v857_v42 }
 0x365   : > { %v1608_v53 = vpop.eup %1607  ;;  %1455 = vmatpush3.bf16.msra.mxu0 %v1577_v0 }
 0x366   : > { %v858_v55 = vpack.c.bf16 %v1608_v53, %v1604_v49  ;;  %v1610_v58 = vpop.eup %1609  ;;  %v847_v59 = vsel %vm306_vm0, %v1608_v53, 0.0  ;;  %1456 = vmatprep.subr.bf16.mxu0 %v1578_v1 }
 0x367   : > { %572 = vadd.xlane.f32.xlu0 %v571_v56  ;;  %851 = vadd.xlane.f32.xlu1 %v850_v57  ;;  %v859_v60 = vpack.c.bf16 %v1610_v58, %v1606_v52  ;;  %v853_v61 = vsel %vm306_vm0, %v1610_v58, 0.0 }
 0x368   : > { %1450 = vmatprep.mubr.msk.bf16.mxu0 %vm306_vm0, %v858_v55 }
 0x369   : > { %1457 = vmatpush3.bf16.msra.mxu0 %v1578_v1 }
 0x36b   : > { %848 = vadd.xlane.f32.xlu0 %v847_v59 }
 0x36c   : > { %1451 = vmatmul.mubr.msk.bf16.gmra.mxu0 %vm306_vm0, %v859_v60 }
 0x36f   : > { %854 = vadd.xlane.f32.xlu0 %v853_v61 }
 0x3c0   : > { %v558_v6 = vpop.xlane.xlu1 %557 }
 0x3c4   : > { %v552_v2 = vpop.xlane.xlu0 %551 }
 0x3c5   : > { %1611 = vrcp.f32 %v552_v2 }
 0x3c6   : > { %v555_v7 = vpop.xlane.xlu1 %554 }
 0x3c8   : > { %v561_v3 = vpop.xlane.xlu0 %560 }
 0x3c9   : > { %1613 = vrcp.f32 %v561_v3 }
 0x3ca   : > { %v570_v9 = vpop.xlane.xlu1 %569  ;;  %1615 = vrcp.f32 %v555_v7 }
 0x3cb   : > { %1617 = vrcp.f32 %v558_v6 }
 0x3ce   : > { %v564_v11 = vpop.xlane.xlu1 %563 }
 0x3cf   : > { %1619 = vrcp.f32 %v564_v11 }
 0x3d0   : > { %v567_v4 = vpop.xlane.xlu0 %566 }
 0x3d2   : > { %v1612_v15 = vpop.eup %1611 }
 0x3d6   : > { %v1614_v17 = vpop.eup %1613 }
 0x3d7   : > { %v1616_v54 = vpop.eup %1615 }
 0x3d8   : > { %v1618_v18 = vpop.eup %1617 }
 0x3dc   : > { %v1620_v35 = vpop.eup %1619 }
 0x3e0   : > { %v840_v46 = vpop.xlane.xlu1 %839 }
 0x3e4   : > { %v834_v5 = vpop.xlane.xlu0 %833 }
 0x3e8   : > { %v843_v8 = vpop.xlane.xlu0 %842 }
 0x3ec   : > { %v837_v10 = vpop.xlane.xlu0 %836  ;;  %v846_v29 = vpop.xlane.xlu1 %845 }
 0x3f0   : > { %v573_v12 = vpop.xlane.xlu0 %572  ;;  %v852_v32 = vpop.xlane.xlu1 %851 }
 0x3f1   : > { %1621 = vrcp.f32 %v573_v12 }
 0x3f2   : > { %1623 = vrcp.f32 %v567_v4 }
 0x3f3   : > { %1625 = vrcp.f32 %v570_v9 }
 0x3f4   : > { %1627 = vrcp.f32 %v834_v5  ;;  %v849_v28 = vpop.xlane.xlu0 %848 }
 0x3f5   : > { %1629 = vrcp.f32 %v843_v8 }
 0x3f6   : > { %1631 = vrcp.f32 %v837_v10 }
 0x3f7   : > { %1633 = vrcp.f32 %v840_v46 }
 0x3f8   : > { %v855_v47 = vpop.xlane.xlu0 %854  ;;  %1635 = vrcp.f32 %v846_v29 }
 0x3f9   : > { %1637 = vrcp.f32 %v855_v47 }
 0x3fa   : > { %1639 = vrcp.f32 %v849_v28 }
 0x3fb   : > { %1641 = vrcp.f32 %v852_v32 }
 0x3fe   : > { %v1622_v21 = vpop.eup %1621 }
 0x3ff   : > { %v1624_v36 = vpop.eup %1623 }
 0x400   : > { %v1416_v13 = vpop.f32.mrf.mxu0  ;;  %v1626_v39 = vpop.eup %1625 }
 0x401   : > { %v665_v27 = vmul.f32 %v1618_v18, %v1416_v13  ;;  %v1628_v44 = vpop.eup %1627 }
 0x402   : > { %v624_v14 = vpop.f32.mrf.mxu0  ;;  %v1630_v42 = vpop.eup %1629 }
 0x403   : > { %v663_v23 = vmul.f32 %v1612_v15, %v624_v14  ;;  %v1632_v50 = vpop.eup %1631  ;;  %v1338_v15 = vld [vmem:[%s2214_s3] ss:$0 sm:$0xff] }
 0x404   : > { %v1417_v16 = vpop.f32.mrf.mxu0  ;;  %v1634_v53 = vpop.eup %1633 }
 0x405   : > { %v666_v19 = vmul.f32 %v1614_v17, %v1417_v16  ;;  %v1636_v62 = vpop.eup %1635 }
 0x406   : > { %v627_v22 = vpop.f32.mrf.mxu0  ;;  %v1638_v0 = vpop.eup %1637 }
 0x407   : > { %v664_v26 = vmul.f32 %v1616_v54, %v627_v22  ;;  %v672_v33 = vpack.c.bf16 %v666_v19, %v665_v27  ;;  %v1640_v1 = vpop.eup %1639 }
 0x408   : > { %v1642_v4 = vpop.eup %1641 }
 0x409   : > { %v671_v30 = vpack.c.bf16 %v664_v26, %v663_v23  ;;  %v1420_v31 = vpop.f32.mrf.mxu0 }
 0x40a   : > { %v669_v41 = vmul.f32 %v1626_v39, %v1420_v31 }
 0x40b   : > { %v640_v34 = vpop.f32.mrf.mxu0  ;;  %1470 = vmatprep.mubr.msk.bf16.mxu1 %vm412_vm1, %v671_v30 }
 0x40c   : > { %1471 = vmatmul.mubr.msk.bf16.vlgmr.msra.gmra.mxu1 %vm412_vm1, %v672_v33  ;;  %v667_v40 = vmul.f32 %v1620_v35, %v640_v34 }
 0x40d   : > { %v1421_v20 = vpop.f32.mrf.mxu0 }
 0x40e   : > { %v670_v37 = vmul.f32 %v1622_v21, %v1421_v20 }
 0x40f   : > { %v643_v38 = vpop.f32.mrf.mxu0 }
 0x410   : > { %v668_v24 = vmul.f32 %v1624_v36, %v643_v38  ;;  %v674_v25 = vpack.c.bf16 %v670_v37, %v669_v41 }
 0x412   : > { %v673_v45 = vpack.c.bf16 %v668_v24, %v667_v40 }
 0x414   : > { %1474 = vmatprep.mubr.msk.bf16.mxu1 %vm412_vm1, %v673_v45 }
 0x415   : > { %1475 = vmatmul.mubr.msk.bf16.gmra.mxu1 %vm412_vm1, %v674_v25 }
 0x424   : > { %v1448_v43 = vpop.f32.mrf.mxu0 }
 0x425   : > { %v963_v57 = vmul.f32 %v1634_v53, %v1448_v43 }
 0x426   : > { %v922_v48 = vpop.f32.mrf.mxu0 }
 0x427   : > { %v961_v55 = vmul.f32 %v1628_v44, %v922_v48 }
 0x428   : > { %v1449_v49 = vpop.f32.mrf.mxu0 }
 0x429   : > { %v964_v51 = vmul.f32 %v1630_v42, %v1449_v49 }
 0x42a   : > { %v925_v52 = vpop.f32.mrf.mxu0 }
 0x42b   : > { %v962_v56 = vmul.f32 %v1632_v50, %v925_v52  ;;  %v970_v60 = vpack.c.bf16 %v964_v51, %v963_v57 }
 0x42c   : > { %v1452_v58 = vpop.f32.mrf.mxu0 }
 0x42d   : > { %v969_v59 = vpack.c.bf16 %v962_v56, %v961_v55  ;;  %v967_v7 = vmul.f32 %v1642_v4, %v1452_v58 }
 0x42e   : > { %v938_v61 = vpop.f32.mrf.mxu0 }
 0x42f   : > { %1458 = vmatprep.mubr.msk.bf16.mxu0 %vm412_vm1, %v969_v59  ;;  %v965_v5 = vmul.f32 %v1636_v62, %v938_v61 }
 0x430   : > { %v1453_v63 = vpop.f32.mrf.mxu0  ;;  %1459 = vmatmul.mubr.msk.bf16.vlgmr.msra.gmra.mxu0 %vm412_vm1, %v970_v60 }
 0x431   : > { %v968_v2 = vmul.f32 %v1638_v0, %v1453_v63 }
 0x432   : > { %v941_v3 = vpop.f32.mrf.mxu0 }
 0x433   : > { %v966_v6 = vmul.f32 %v1640_v1, %v941_v3  ;;  %v972_v9 = vpack.c.bf16 %v968_v2, %v967_v7 }
 0x435   : > { %v971_v8 = vpack.c.bf16 %v966_v6, %v965_v5 }
 0x437   : > { %1462 = vmatprep.mubr.msk.bf16.mxu0 %vm412_vm1, %v971_v8 }
 0x438   : > { %1463 = vmatmul.mubr.msk.bf16.gmra.mxu0 %vm412_vm1, %v972_v9 }
 0x4cc   : > { %v1472_v10 = vpop.f32.mrf.mxu1 }
 0x4ce   : > { %v1125_v11 = vpop.f32.mrf.mxu1 }
 0x4d0   : > { %v1473_v12 = vpop.f32.mrf.mxu1 }
 0x4d2   : > { %v1128_v13 = vpop.f32.mrf.mxu1 }
 0x4d5   : > { %v1476_v17 = vpop.f32.mrf.mxu1 }
 0x4d7   : > { %v1141_v27 = vpop.f32.mrf.mxu1 }
 0x4d9   : > { %v1477_v21 = vpop.f32.mrf.mxu1 }
 0x4db   : > { %v1144_v41 = vpop.f32.mrf.mxu1 }
 0x4f0   : > { %v1460_v14 = vpop.f32.mrf.mxu0 }
 0x4f1   : > { %v1134_v16 = vadd.f32 %v1472_v10, %v1460_v14 }
 0x4f2   : > { %v1036_v54 = vpop.f32.mrf.mxu0 }
 0x4f3   : > { %v1165_v19 = vadd.f32 %v1338_v15, %v1134_v16  ;;  %v1126_v22 = vadd.f32 %v1125_v11, %v1036_v54 }
 0x4f4   : > { %v1461_v18 = vpop.f32.mrf.mxu0 }
 0x4f5   : > { %1173 = vst.msk [vmem:[%s2143_s9 + $0x10] sm:$0xff] %vm306_vm0, %v1165_v19  ;;  %v1163_v23 = vadd.f32 %v1338_v15, %v1126_v22  ;;  %v1137_v26 = vadd.f32 %v1473_v12, %v1461_v18 }
 0x4f6   : > { %v1039_v30 = vpop.f32.mrf.mxu0 }
 0x4f7   : > { %1171 = vst.msk [vmem:[%s2143_s9] sm:$0xff] %vm306_vm0, %v1163_v23  ;;  %v1166_v31 = vadd.f32 %v1338_v15, %v1137_v26  ;;  %v1129_v33 = vadd.f32 %v1128_v13, %v1039_v30 }
 0x4f8   : > { %v1464_v34 = vpop.f32.mrf.mxu0 }
 0x4f9   : > { %1174 = vst.msk [vmem:[%s2143_s9 + $0x18] sm:$0xff] %vm306_vm0, %v1166_v31  ;;  %v1164_v35 = vadd.f32 %v1338_v15, %v1129_v33  ;;  %v1150_v20 = vadd.f32 %v1476_v17, %v1464_v34 }
 0x4fa   : > { %v1052_v36 = vpop.f32.mrf.mxu0 }
 0x4fb   : > { %1172 = vst.msk [vmem:[%s2143_s9 + $0x8] sm:$0xff] %vm306_vm0, %v1164_v35  ;;  %v1169_v37 = vadd.f32 %v1338_v15, %v1150_v20  ;;  %v1142_v38 = vadd.f32 %v1141_v27, %v1052_v36 }
 0x4fc   : > { %v1465_v39 = vpop.f32.mrf.mxu0 }
 0x4fd   : > { %1177 = vst.msk [vmem:[%s2143_s9 + $0x30] sm:$0xff] %vm306_vm0, %v1169_v37  ;;  %v1167_v40 = vadd.f32 %v1338_v15, %v1142_v38  ;;  %v1153_v24 = vadd.f32 %v1477_v21, %v1465_v39 }
 0x4fe   : > { %v1055_v45 = vpop.f32.mrf.mxu0 }
 0x4ff   : > { %1175 = vst.msk [vmem:[%s2143_s9 + $0x20] sm:$0xff] %vm306_vm0, %v1167_v40  ;;  %v1170_v25 = vadd.f32 %v1338_v15, %v1153_v24  ;;  %v1145_v46 = vadd.f32 %v1144_v41, %v1055_v45 }
 0x501   : > { %1178 = vst.msk [vmem:[%s2143_s9 + $0x38] sm:$0xff] %vm306_vm0, %v1170_v25  ;;  %v1168_v28 = vadd.f32 %v1338_v15, %v1145_v46 }
 0x503   : > { %1176 = vst.msk [vmem:[%s2143_s9 + $0x28] sm:$0xff] %vm306_vm0, %v1168_v28 }
 0x504   : > { %1736 = shalt.err (!%p1733_p3)
}
 0x505   : > { %s1737_s10 = scalar_lea.hbm %s2162_s6, 1024  ;;  %s1741_s30 = scalar_lea.hbm %s2215_s4, 2048 }
 0x506   : > { %p1738_p11 = scmp.ne.s32.totalorder %s2162_s6, %s1737_s10  ;;  %p1742_p4 = scmp.lt.s32.totalorder %s2162_s6, %s2215_s4 }
 0x507   : > { %p1743_p6 = scmp.lt.s32.totalorder %s1741_s30, %s1737_s10 }
 0x508   : > { %p1739_p9 = pnand %p1738_p11, %p2230_p2 }
 0x509   : > { %p1744_p8 = por %p1743_p6, %p1742_p4 }
 0x50a   : > { %p1740_p1 = pneg %p1739_p9 }
 0x50c   : > { %p1745_p10 = pnand %p1744_p8, %p1740_p1 }
 0x50e   : > { %1748 = shalt.err (!%p1745_p10)
}
 0x50f   : > { %s1805_s9 = smov 128   ;;  %s1806_s11 = smov 8  }
 0x510   : > { %1496 = dma.vmem_to_hbm [thread:$0]  (%p2230_p2), %s2164_s28, 1024, %s2162_s6, %s1180_s19, %s1805_s9, %s1805_s9, %s1806_s11  }
 0x511 PF: > { %s1208_s29 = sand.u32 1, %s1779_s15   ;;  %p2231_p7 = scmp.ne.s32.totalorder %s2221_s22, 0 }
 0x512   : > { %p2232_p12 = scmp.ge.s32.totalorder %s1791_s18, 2  ;;  %s1209_s26 = scalar_lea.sflag [#allocation4], %s1208_s29 }
 0x514   : > { %p1510_p13 = pnand %p2232_p12, %p2231_p7 }
 0x516   : > { %p1511_p0 = pneg %p1510_p13 }
 0x518   : > { %1774 = dma.done.wait (%p1511_p0), %s1209_s26, 1024  }
 0x519   : > { %1776 = vsyncadd (%p1511_p0), %s1209_s26, 4294966272  ;;  %p18_p5 = scmp.ge.s32.totalorder %s1907_s13, 4   ;;  %s2233_s15 = smov %s1783_s16 }
 0x51a   : > { %s2234_s16 = smov %s1787_s17  ;;  %s2235_s17 = smov %s1916_s24 }
 0x51b   : > { %s2236_s18 = smov %s1907_s13  ;;  %20 = sbr.rel (!%p18_p5) target bundleno = 6 (0x6), region = 90 }
 0x520   :  { %1214 = vsyncpa [#allocation3], 1 }
 0x521   :  { %1216 = vsyncpa [#allocation3 + $0x1], 1 }
 0x522   :  { %1217 = vsyncpa [#allocation6], 1 }
 0x523   :  { %1218 = vsyncpa [#allocation4], 1 }
 0x524   :  { %1220 = vsyncpa [#allocation4 + $0x1], 1 }

</bundles_post_ra>
